<compile_context>
chip_gen: v6e
topology: v6e:2x2x1
jax: 0.10.0
libtpu: 0.0.40
codegen_flags: <defaults>
</compile_context>

<pallas_src>
import functools

import jax
import jax.numpy as jnp
from jax import lax
from jax.experimental import pallas as pl
from jax.experimental.pallas import tpu as pltpu


def _focal_strip(x, t, gamma):
    """Unweighted focal term for one (rows, 128) f32 strip. Pure VPU/EUP work.

    Numerically-stable binary_cross_entropy_with_logits (reduction='none'):
        bce = max(x, 0) - x*t + log1p(exp(-|x|))
    pt  = exp(-bce)   (exact; matches the PyTorch reference)
    returns (1 - pt)**gamma * bce   (alpha and the /L mean are applied once at
    finalize time, not per element).
    """
    xmax = jnp.maximum(x, 0.0)
    bce = xmax - x * t + jnp.log1p(jnp.exp(-jnp.abs(x)))
    pt = jnp.exp(-bce)
    return (1.0 - pt) ** gamma * bce


def _accumulate_strips(pred_ref, tgt_ref, acc_ref, *, gamma, n_full,
                       partial_cols):
    """Accumulate n_full fully-valid 128-lane strips plus one optional ragged
    strip with `partial_cols` valid lanes into the lane-dense accumulator."""
    for j in range(n_full):
        c0 = j * 128                       # static, 128-aligned slice
        x = pred_ref[:, c0:c0 + 128].astype(jnp.float32)
        t = tgt_ref[:, c0:c0 + 128].astype(jnp.float32)
        acc_ref[...] += _focal_strip(x, t, gamma)
    if partial_cols:
        c0 = n_full * 128
        x = pred_ref[:, c0:c0 + 128].astype(jnp.float32)
        t = tgt_ref[:, c0:c0 + 128].astype(jnp.float32)
        f = _focal_strip(x, t, gamma)
        lane = lax.broadcasted_iota(jnp.int32, f.shape, 1)
        # select (NOT multiply-by-mask): NaN/Inf from out-of-bounds lanes must
        # never leak into the sum.
        acc_ref[...] += jnp.where(lane < partial_cols, f, 0.0)


def _focal_kernel(pred_ref, tgt_ref, out_ref, acc_ref, *,
                  alpha, gamma, chunk, total_elems):
    """Processes one (TN, chunk) slab; grid axis 1 is the L reduction."""
    k = pl.program_id(1)
    nk = pl.cdiv(total_elems, chunk)       # static
    nseg = chunk // 128
    rem = total_elems % chunk               # valid cols in the last chunk

    @pl.when(k == 0)
    def _init():
        acc_ref[...] = jnp.zeros_like(acc_ref)

    if rem == 0:
        # L divides evenly: one unmasked path for every step.
        _accumulate_strips(pred_ref, tgt_ref, acc_ref, gamma=gamma,
                           n_full=nseg, partial_cols=0)
    elif nk == 1:
        # Single (ragged) chunk.
        _accumulate_strips(pred_ref, tgt_ref, acc_ref, gamma=gamma,
                           n_full=rem // 128, partial_cols=rem % 128)
    else:
        # Full-speed unmasked path for all but the last step; the mask (and
        # the skipped fully-invalid strips) exist only in the final step.
        @pl.when(k < nk - 1)
        def _full_chunks():
            _accumulate_strips(pred_ref, tgt_ref, acc_ref, gamma=gamma,
                               n_full=nseg, partial_cols=0)

        @pl.when(k == nk - 1)
        def _ragged_chunk():
            _accumulate_strips(pred_ref, tgt_ref, acc_ref, gamma=gamma,
                               n_full=rem // 128, partial_cols=rem % 128)

    @pl.when(k == nk - 1)
    def _finalize():
        # Single cross-lane (XLU) 128 -> 1 reduce, alpha/mean scale, one store.
        row_sum = jnp.sum(acc_ref[...], axis=-1, keepdims=True)
        out_ref[...] = (row_sum * (alpha / total_elems)).astype(out_ref.dtype)


def focal_loss(pred, target, alpha=0.8, gamma=2):
    """Pallas implementation of FocalLoss.forward.

    pred, target: (N, C, H, W) logits / {0,1} targets (f32 or bf16; the kernel
    upcasts per strip, so narrow dtypes flow through the DMA untouched).
    Returns: (N,) float32, the focal loss averaged over dims (1, 2, 3).
    """
    assert pred.shape == target.shape and pred.ndim == 4
    N, C, H, W = pred.shape
    L = C * H * W

    pred2d = pred.reshape(N, L)
    tgt2d = target.reshape(N, L)

    # Integer gamma lowers (1 - pt)**gamma to multiplies, not exp(g*log(.)).
    if isinstance(gamma, float) and float(gamma).is_integer():
        gamma = int(gamma)

    # ---- Row tile ----
    # <=64 rows so the fused per-strip chain (~5-6 live (TN,128) f32 temps)
    # fits the 64-vreg file; prefer >=2 batch tiles so both v7x TensorCores
    # get work under dimension_semantics=("parallel", ...).
    if N % 8 == 0:
        TN = min(N, 64)
        if N // TN < 2 and N >= 16:
            TN = max(8, (N // 2) // 8 * 8)
    else:
        TN = N          # full (unaligned) batch dim is always a legal block dim

    # ---- Generation-aware VMEM budget ----
    try:
        vmem_cap = pltpu.get_tpu_info().vmem_capacity_bytes
    except Exception:  # pragma: no cover - conservative fallback
        vmem_cap = 64 * 1024 * 1024
    if vmem_cap >= 100 * 1024 * 1024:       # v5e / v6e: 128 MiB physical VMEM
        in_budget = 48 * 1024 * 1024
        vmem_limit = 96 * 1024 * 1024
    else:                                   # v7x: 64 MiB physical / 32 scoped
        in_budget = 16 * 1024 * 1024
        vmem_limit = 32 * 1024 * 1024

    # L chunk: multiple of 128 lanes, sized so the double-buffered input
    # footprint (2 buffers x (pred + target bytes) x TN x chunk) fits the
    # budget; capped at 16384 (128 unrolled strips) to bound code size.
    bytes_per_col = 2 * (pred2d.dtype.itemsize + tgt2d.dtype.itemsize) * TN
    max_chunk = max(128, (in_budget // bytes_per_col) // 128 * 128)
    L_padded = pl.cdiv(L, 128) * 128
    chunk = min(max_chunk, L_padded, 16384)

    grid = (pl.cdiv(N, TN), pl.cdiv(L, chunk))

    kernel = functools.partial(
        _focal_kernel,
        alpha=float(alpha),
        gamma=gamma,
        chunk=chunk,
        total_elems=L,
    )

    out = pl.pallas_call(
        kernel,
        out_shape=jax.ShapeDtypeStruct((N, 1), jnp.float32),
        grid_spec=pltpu.PrefetchScalarGridSpec(
            num_scalar_prefetch=0,
            grid=grid,
            in_specs=[
                pl.BlockSpec((TN, chunk), lambda i, k: (i, k)),
                pl.BlockSpec((TN, chunk), lambda i, k: (i, k)),
            ],
            out_specs=pl.BlockSpec((TN, 1), lambda i, k: (i, 0)),
            scratch_shapes=[pltpu.VMEM((TN, 128), jnp.float32)],
        ),
        compiler_params=pltpu.CompilerParams(
            dimension_semantics=("parallel", "arbitrary"),
            vmem_limit_bytes=vmem_limit,
        ),
    )(pred2d, tgt2d)

    return out.reshape(N)


def _focal_loss_ref(pred, target, alpha=0.8, gamma=2):
    x = pred.astype(jnp.float32)
    t = target.astype(jnp.float32)
    bce = jnp.maximum(x, 0.0) - x * t + jnp.log1p(jnp.exp(-jnp.abs(x)))
    pt = jnp.exp(-bce)
    focal = alpha * (1.0 - pt) ** gamma * bce
    return focal.mean(axis=(1, 2, 3))


if __name__ == "__main__":
    key = jax.random.PRNGKey(0)
    k_pred, k_tgt = jax.random.split(key)

    N, C, H, W = 2, 4, 16, 16
    pred = jax.random.normal(k_pred, (N, C, H, W), dtype=jnp.float32)
    target = jax.random.bernoulli(k_tgt, 0.5, (N, C, H, W)).astype(jnp.float32)

    out = focal_loss(pred, target, alpha=0.8, gamma=2)
    out = jax.block_until_ready(out)

    ref = _focal_loss_ref(pred, target, alpha=0.8, gamma=2)
    assert out.shape == (N,)
    assert jnp.allclose(out, ref, rtol=1e-4, atol=1e-6), (out, ref)

    print("KERNEL_OK")
</pallas_src>

<mosaic_0001>
module attributes {stable_mosaic.version = 11 : i64} {
  func.func @_focal_kernel(%arg0: i32, %arg1: i32, %arg2: memref<2x1024xf32, #tpu.memory_space<vmem>>, %arg3: memref<2x1024xf32, #tpu.memory_space<vmem>>, %arg4: memref<2x1xf32, #tpu.memory_space<vmem>>, %arg5: memref<2x128xf32, #tpu.memory_space<vmem>>) attributes {dimension_semantics = [#tpu.dimension_semantics<parallel>, #tpu.dimension_semantics<arbitrary>], iteration_bounds = array<i64: 1, 1>, scalar_prefetch = 0 : i64, scratch_operands = 1 : i64, tpu.core_type = #tpu.core_type<tc>, window_params = [{transform_indices = @transform_0, window_bounds = array<i64: 2, 1024>}, {transform_indices = @transform_1, window_bounds = array<i64: 2, 1024>}, {transform_indices = @transform_2, window_bounds = array<i64: 2, 1>}]} {
    %c0_i32 = arith.constant 0 : i32
    %0 = arith.cmpi eq, %arg1, %c0_i32 : i32
    %1 = arith.extui %0 : i1 to i32
    %c0_i32_0 = arith.constant 0 : i32
    %2 = arith.cmpi ne, %1, %c0_i32_0 : i32
    scf.if %2 {
      %cst_90 = arith.constant 0.000000e+00 : f32
      %182 = vector.broadcast %cst_90 : f32 to vector<2x128xf32>
      %c0_91 = arith.constant 0 : index
      %c0_92 = arith.constant 0 : index
      %183 = vector.load %arg5[%c0_91, %c0_92] : memref<2x128xf32, #tpu.memory_space<vmem>>, vector<2x128xf32>
      tpu.vector_store %arg5[%c0_91, %c0_92], %182 {strides = array<i32>} : memref<2x128xf32, #tpu.memory_space<vmem>>, vector<2x128xf32>,
    } else {
    }
    %c0 = arith.constant 0 : index
    %c0_1 = arith.constant 0 : index
    %3 = vector.load %arg2[%c0, %c0_1] : memref<2x1024xf32, #tpu.memory_space<vmem>>, vector<2x128xf32>
    %c0_2 = arith.constant 0 : index
    %c0_3 = arith.constant 0 : index
    %4 = vector.load %arg3[%c0_2, %c0_3] : memref<2x1024xf32, #tpu.memory_space<vmem>>, vector<2x128xf32>
    %c0_4 = arith.constant 0 : index
    %c0_5 = arith.constant 0 : index
    %5 = vector.load %arg5[%c0_4, %c0_5] : memref<2x128xf32, #tpu.memory_space<vmem>>, vector<2x128xf32>
    %cst = arith.constant 0.000000e+00 : f32
    %6 = vector.broadcast %cst : f32 to vector<2x128xf32>
    %7 = arith.maximumf %3, %6 : vector<2x128xf32>
    %8 = arith.mulf %3, %4 : vector<2x128xf32>
    %9 = arith.subf %7, %8 : vector<2x128xf32>
    %10 = math.absf %3 : vector<2x128xf32>
    %cst_6 = arith.constant 0.000000e+00 : f32
    %11 = vector.broadcast %cst_6 : f32 to vector<2x128xf32>
    %12 = arith.subf %11, %10 : vector<2x128xf32>
    %13 = math.exp %12 : vector<2x128xf32>
    %14 = math.log1p %13 : vector<2x128xf32>
    %15 = arith.addf %9, %14 : vector<2x128xf32>
    %cst_7 = arith.constant 0.000000e+00 : f32
    %16 = vector.broadcast %cst_7 : f32 to vector<2x128xf32>
    %17 = arith.subf %16, %15 : vector<2x128xf32>
    %18 = math.exp %17 : vector<2x128xf32>
    %cst_8 = arith.constant 1.000000e+00 : f32
    %19 = vector.broadcast %cst_8 : f32 to vector<2x128xf32>
    %20 = arith.subf %19, %18 : vector<2x128xf32>
    %21 = arith.mulf %20, %20 : vector<2x128xf32>
    %22 = arith.mulf %21, %15 : vector<2x128xf32>
    %23 = arith.addf %5, %22 : vector<2x128xf32>
    %c0_9 = arith.constant 0 : index
    %c0_10 = arith.constant 0 : index
    %24 = vector.load %arg5[%c0_9, %c0_10] : memref<2x128xf32, #tpu.memory_space<vmem>>, vector<2x128xf32>
    tpu.vector_store %arg5[%c0_9, %c0_10], %23 {strides = array<i32>} : memref<2x128xf32, #tpu.memory_space<vmem>>, vector<2x128xf32>,
    %c0_11 = arith.constant 0 : index
    %c128 = arith.constant 128 : index
    %25 = vector.load %arg2[%c0_11, %c128] : memref<2x1024xf32, #tpu.memory_space<vmem>>, vector<2x128xf32>
    %c0_12 = arith.constant 0 : index
    %c128_13 = arith.constant 128 : index
    %26 = vector.load %arg3[%c0_12, %c128_13] : memref<2x1024xf32, #tpu.memory_space<vmem>>, vector<2x128xf32>
    %c0_14 = arith.constant 0 : index
    %c0_15 = arith.constant 0 : index
    %27 = vector.load %arg5[%c0_14, %c0_15] : memref<2x128xf32, #tpu.memory_space<vmem>>, vector<2x128xf32>
    %cst_16 = arith.constant 0.000000e+00 : f32
    %28 = vector.broadcast %cst_16 : f32 to vector<2x128xf32>
    %29 = arith.maximumf %25, %28 : vector<2x128xf32>
    %30 = arith.mulf %25, %26 : vector<2x128xf32>
    %31 = arith.subf %29, %30 : vector<2x128xf32>
    %32 = math.absf %25 : vector<2x128xf32>
    %cst_17 = arith.constant 0.000000e+00 : f32
    %33 = vector.broadcast %cst_17 : f32 to vector<2x128xf32>
    %34 = arith.subf %33, %32 : vector<2x128xf32>
    %35 = math.exp %34 : vector<2x128xf32>
    %36 = math.log1p %35 : vector<2x128xf32>
    %37 = arith.addf %31, %36 : vector<2x128xf32>
    %cst_18 = arith.constant 0.000000e+00 : f32
    %38 = vector.broadcast %cst_18 : f32 to vector<2x128xf32>
    %39 = arith.subf %38, %37 : vector<2x128xf32>
    %40 = math.exp %39 : vector<2x128xf32>
    %cst_19 = arith.constant 1.000000e+00 : f32
    %41 = vector.broadcast %cst_19 : f32 to vector<2x128xf32>
    %42 = arith.subf %41, %40 : vector<2x128xf32>
    %43 = arith.mulf %42, %42 : vector<2x128xf32>
    %44 = arith.mulf %43, %37 : vector<2x128xf32>
    %45 = arith.addf %27, %44 : vector<2x128xf32>
    %c0_20 = arith.constant 0 : index
    %c0_21 = arith.constant 0 : index
    %46 = vector.load %arg5[%c0_20, %c0_21] : memref<2x128xf32, #tpu.memory_space<vmem>>, vector<2x128xf32>
    tpu.vector_store %arg5[%c0_20, %c0_21], %45 {strides = array<i32>} : memref<2x128xf32, #tpu.memory_space<vmem>>, vector<2x128xf32>,
    %c0_22 = arith.constant 0 : index
    %c256 = arith.constant 256 : index
    %47 = vector.load %arg2[%c0_22, %c256] : memref<2x1024xf32, #tpu.memory_space<vmem>>, vector<2x128xf32>
    %c0_23 = arith.constant 0 : index
    %c256_24 = arith.constant 256 : index
    %48 = vector.load %arg3[%c0_23, %c256_24] : memref<2x1024xf32, #tpu.memory_space<vmem>>, vector<2x128xf32>
    %c0_25 = arith.constant 0 : index
    %c0_26 = arith.constant 0 : index
    %49 = vector.load %arg5[%c0_25, %c0_26] : memref<2x128xf32, #tpu.memory_space<vmem>>, vector<2x128xf32>
    %cst_27 = arith.constant 0.000000e+00 : f32
    %50 = vector.broadcast %cst_27 : f32 to vector<2x128xf32>
    %51 = arith.maximumf %47, %50 : vector<2x128xf32>
    %52 = arith.mulf %47, %48 : vector<2x128xf32>
    %53 = arith.subf %51, %52 : vector<2x128xf32>
    %54 = math.absf %47 : vector<2x128xf32>
    %cst_28 = arith.constant 0.000000e+00 : f32
    %55 = vector.broadcast %cst_28 : f32 to vector<2x128xf32>
    %56 = arith.subf %55, %54 : vector<2x128xf32>
    %57 = math.exp %56 : vector<2x128xf32>
    %58 = math.log1p %57 : vector<2x128xf32>
    %59 = arith.addf %53, %58 : vector<2x128xf32>
    %cst_29 = arith.constant 0.000000e+00 : f32
    %60 = vector.broadcast %cst_29 : f32 to vector<2x128xf32>
    %61 = arith.subf %60, %59 : vector<2x128xf32>
    %62 = math.exp %61 : vector<2x128xf32>
    %cst_30 = arith.constant 1.000000e+00 : f32
    %63 = vector.broadcast %cst_30 : f32 to vector<2x128xf32>
    %64 = arith.subf %63, %62 : vector<2x128xf32>
    %65 = arith.mulf %64, %64 : vector<2x128xf32>
    %66 = arith.mulf %65, %59 : vector<2x128xf32>
    %67 = arith.addf %49, %66 : vector<2x128xf32>
    %c0_31 = arith.constant 0 : index
    %c0_32 = arith.constant 0 : index
    %68 = vector.load %arg5[%c0_31, %c0_32] : memref<2x128xf32, #tpu.memory_space<vmem>>, vector<2x128xf32>
    tpu.vector_store %arg5[%c0_31, %c0_32], %67 {strides = array<i32>} : memref<2x128xf32, #tpu.memory_space<vmem>>, vector<2x128xf32>,
    %c0_33 = arith.constant 0 : index
    %c384 = arith.constant 384 : index
    %69 = vector.load %arg2[%c0_33, %c384] : memref<2x1024xf32, #tpu.memory_space<vmem>>, vector<2x128xf32>
    %c0_34 = arith.constant 0 : index
    %c384_35 = arith.constant 384 : index
    %70 = vector.load %arg3[%c0_34, %c384_35] : memref<2x1024xf32, #tpu.memory_space<vmem>>, vector<2x128xf32>
    %c0_36 = arith.constant 0 : index
    %c0_37 = arith.constant 0 : index
    %71 = vector.load %arg5[%c0_36, %c0_37] : memref<2x128xf32, #tpu.memory_space<vmem>>, vector<2x128xf32>
    %cst_38 = arith.constant 0.000000e+00 : f32
    %72 = vector.broadcast %cst_38 : f32 to vector<2x128xf32>
    %73 = arith.maximumf %69, %72 : vector<2x128xf32>
    %74 = arith.mulf %69, %70 : vector<2x128xf32>
    %75 = arith.subf %73, %74 : vector<2x128xf32>
    %76 = math.absf %69 : vector<2x128xf32>
    %cst_39 = arith.constant 0.000000e+00 : f32
    %77 = vector.broadcast %cst_39 : f32 to vector<2x128xf32>
    %78 = arith.subf %77, %76 : vector<2x128xf32>
    %79 = math.exp %78 : vector<2x128xf32>
    %80 = math.log1p %79 : vector<2x128xf32>
    %81 = arith.addf %75, %80 : vector<2x128xf32>
    %cst_40 = arith.constant 0.000000e+00 : f32
    %82 = vector.broadcast %cst_40 : f32 to vector<2x128xf32>
    %83 = arith.subf %82, %81 : vector<2x128xf32>
    %84 = math.exp %83 : vector<2x128xf32>
    %cst_41 = arith.constant 1.000000e+00 : f32
    %85 = vector.broadcast %cst_41 : f32 to vector<2x128xf32>
    %86 = arith.subf %85, %84 : vector<2x128xf32>
    %87 = arith.mulf %86, %86 : vector<2x128xf32>
    %88 = arith.mulf %87, %81 : vector<2x128xf32>
    %89 = arith.addf %71, %88 : vector<2x128xf32>
    %c0_42 = arith.constant 0 : index
    %c0_43 = arith.constant 0 : index
    %90 = vector.load %arg5[%c0_42, %c0_43] : memref<2x128xf32, #tpu.memory_space<vmem>>, vector<2x128xf32>
    tpu.vector_store %arg5[%c0_42, %c0_43], %89 {strides = array<i32>} : memref<2x128xf32, #tpu.memory_space<vmem>>, vector<2x128xf32>,
    %c0_44 = arith.constant 0 : index
    %c512 = arith.constant 512 : index
    %91 = vector.load %arg2[%c0_44, %c512] : memref<2x1024xf32, #tpu.memory_space<vmem>>, vector<2x128xf32>
    %c0_45 = arith.constant 0 : index
    %c512_46 = arith.constant 512 : index
    %92 = vector.load %arg3[%c0_45, %c512_46] : memref<2x1024xf32, #tpu.memory_space<vmem>>, vector<2x128xf32>
    %c0_47 = arith.constant 0 : index
    %c0_48 = arith.constant 0 : index
    %93 = vector.load %arg5[%c0_47, %c0_48] : memref<2x128xf32, #tpu.memory_space<vmem>>, vector<2x128xf32>
    %cst_49 = arith.constant 0.000000e+00 : f32
    %94 = vector.broadcast %cst_49 : f32 to vector<2x128xf32>
    %95 = arith.maximumf %91, %94 : vector<2x128xf32>
    %96 = arith.mulf %91, %92 : vector<2x128xf32>
    %97 = arith.subf %95, %96 : vector<2x128xf32>
    %98 = math.absf %91 : vector<2x128xf32>
    %cst_50 = arith.constant 0.000000e+00 : f32
    %99 = vector.broadcast %cst_50 : f32 to vector<2x128xf32>
    %100 = arith.subf %99, %98 : vector<2x128xf32>
    %101 = math.exp %100 : vector<2x128xf32>
    %102 = math.log1p %101 : vector<2x128xf32>
    %103 = arith.addf %97, %102 : vector<2x128xf32>
    %cst_51 = arith.constant 0.000000e+00 : f32
    %104 = vector.broadcast %cst_51 : f32 to vector<2x128xf32>
    %105 = arith.subf %104, %103 : vector<2x128xf32>
    %106 = math.exp %105 : vector<2x128xf32>
    %cst_52 = arith.constant 1.000000e+00 : f32
    %107 = vector.broadcast %cst_52 : f32 to vector<2x128xf32>
    %108 = arith.subf %107, %106 : vector<2x128xf32>
    %109 = arith.mulf %108, %108 : vector<2x128xf32>
    %110 = arith.mulf %109, %103 : vector<2x128xf32>
    %111 = arith.addf %93, %110 : vector<2x128xf32>
    %c0_53 = arith.constant 0 : index
    %c0_54 = arith.constant 0 : index
    %112 = vector.load %arg5[%c0_53, %c0_54] : memref<2x128xf32, #tpu.memory_space<vmem>>, vector<2x128xf32>
    tpu.vector_store %arg5[%c0_53, %c0_54], %111 {strides = array<i32>} : memref<2x128xf32, #tpu.memory_space<vmem>>, vector<2x128xf32>,
    %c0_55 = arith.constant 0 : index
    %c640 = arith.constant 640 : index
    %113 = vector.load %arg2[%c0_55, %c640] : memref<2x1024xf32, #tpu.memory_space<vmem>>, vector<2x128xf32>
    %c0_56 = arith.constant 0 : index
    %c640_57 = arith.constant 640 : index
    %114 = vector.load %arg3[%c0_56, %c640_57] : memref<2x1024xf32, #tpu.memory_space<vmem>>, vector<2x128xf32>
    %c0_58 = arith.constant 0 : index
    %c0_59 = arith.constant 0 : index
    %115 = vector.load %arg5[%c0_58, %c0_59] : memref<2x128xf32, #tpu.memory_space<vmem>>, vector<2x128xf32>
    %cst_60 = arith.constant 0.000000e+00 : f32
    %116 = vector.broadcast %cst_60 : f32 to vector<2x128xf32>
    %117 = arith.maximumf %113, %116 : vector<2x128xf32>
    %118 = arith.mulf %113, %114 : vector<2x128xf32>
    %119 = arith.subf %117, %118 : vector<2x128xf32>
    %120 = math.absf %113 : vector<2x128xf32>
    %cst_61 = arith.constant 0.000000e+00 : f32
    %121 = vector.broadcast %cst_61 : f32 to vector<2x128xf32>
    %122 = arith.subf %121, %120 : vector<2x128xf32>
    %123 = math.exp %122 : vector<2x128xf32>
    %124 = math.log1p %123 : vector<2x128xf32>
    %125 = arith.addf %119, %124 : vector<2x128xf32>
    %cst_62 = arith.constant 0.000000e+00 : f32
    %126 = vector.broadcast %cst_62 : f32 to vector<2x128xf32>
    %127 = arith.subf %126, %125 : vector<2x128xf32>
    %128 = math.exp %127 : vector<2x128xf32>
    %cst_63 = arith.constant 1.000000e+00 : f32
    %129 = vector.broadcast %cst_63 : f32 to vector<2x128xf32>
    %130 = arith.subf %129, %128 : vector<2x128xf32>
    %131 = arith.mulf %130, %130 : vector<2x128xf32>
    %132 = arith.mulf %131, %125 : vector<2x128xf32>
    %133 = arith.addf %115, %132 : vector<2x128xf32>
    %c0_64 = arith.constant 0 : index
    %c0_65 = arith.constant 0 : index
    %134 = vector.load %arg5[%c0_64, %c0_65] : memref<2x128xf32, #tpu.memory_space<vmem>>, vector<2x128xf32>
    tpu.vector_store %arg5[%c0_64, %c0_65], %133 {strides = array<i32>} : memref<2x128xf32, #tpu.memory_space<vmem>>, vector<2x128xf32>,
    %c0_66 = arith.constant 0 : index
    %c768 = arith.constant 768 : index
    %135 = vector.load %arg2[%c0_66, %c768] : memref<2x1024xf32, #tpu.memory_space<vmem>>, vector<2x128xf32>
    %c0_67 = arith.constant 0 : index
    %c768_68 = arith.constant 768 : index
    %136 = vector.load %arg3[%c0_67, %c768_68] : memref<2x1024xf32, #tpu.memory_space<vmem>>, vector<2x128xf32>
    %c0_69 = arith.constant 0 : index
    %c0_70 = arith.constant 0 : index
    %137 = vector.load %arg5[%c0_69, %c0_70] : memref<2x128xf32, #tpu.memory_space<vmem>>, vector<2x128xf32>
    %cst_71 = arith.constant 0.000000e+00 : f32
    %138 = vector.broadcast %cst_71 : f32 to vector<2x128xf32>
    %139 = arith.maximumf %135, %138 : vector<2x128xf32>
    %140 = arith.mulf %135, %136 : vector<2x128xf32>
    %141 = arith.subf %139, %140 : vector<2x128xf32>
    %142 = math.absf %135 : vector<2x128xf32>
    %cst_72 = arith.constant 0.000000e+00 : f32
    %143 = vector.broadcast %cst_72 : f32 to vector<2x128xf32>
    %144 = arith.subf %143, %142 : vector<2x128xf32>
    %145 = math.exp %144 : vector<2x128xf32>
    %146 = math.log1p %145 : vector<2x128xf32>
    %147 = arith.addf %141, %146 : vector<2x128xf32>
    %cst_73 = arith.constant 0.000000e+00 : f32
    %148 = vector.broadcast %cst_73 : f32 to vector<2x128xf32>
    %149 = arith.subf %148, %147 : vector<2x128xf32>
    %150 = math.exp %149 : vector<2x128xf32>
    %cst_74 = arith.constant 1.000000e+00 : f32
    %151 = vector.broadcast %cst_74 : f32 to vector<2x128xf32>
    %152 = arith.subf %151, %150 : vector<2x128xf32>
    %153 = arith.mulf %152, %152 : vector<2x128xf32>
    %154 = arith.mulf %153, %147 : vector<2x128xf32>
    %155 = arith.addf %137, %154 : vector<2x128xf32>
    %c0_75 = arith.constant 0 : index
    %c0_76 = arith.constant 0 : index
    %156 = vector.load %arg5[%c0_75, %c0_76] : memref<2x128xf32, #tpu.memory_space<vmem>>, vector<2x128xf32>
    tpu.vector_store %arg5[%c0_75, %c0_76], %155 {strides = array<i32>} : memref<2x128xf32, #tpu.memory_space<vmem>>, vector<2x128xf32>,
    %c0_77 = arith.constant 0 : index
    %c896 = arith.constant 896 : index
    %157 = vector.load %arg2[%c0_77, %c896] : memref<2x1024xf32, #tpu.memory_space<vmem>>, vector<2x128xf32>
    %c0_78 = arith.constant 0 : index
    %c896_79 = arith.constant 896 : index
    %158 = vector.load %arg3[%c0_78, %c896_79] : memref<2x1024xf32, #tpu.memory_space<vmem>>, vector<2x128xf32>
    %c0_80 = arith.constant 0 : index
    %c0_81 = arith.constant 0 : index
    %159 = vector.load %arg5[%c0_80, %c0_81] : memref<2x128xf32, #tpu.memory_space<vmem>>, vector<2x128xf32>
    %cst_82 = arith.constant 0.000000e+00 : f32
    %160 = vector.broadcast %cst_82 : f32 to vector<2x128xf32>
    %161 = arith.maximumf %157, %160 : vector<2x128xf32>
    %162 = arith.mulf %157, %158 : vector<2x128xf32>
    %163 = arith.subf %161, %162 : vector<2x128xf32>
    %164 = math.absf %157 : vector<2x128xf32>
    %cst_83 = arith.constant 0.000000e+00 : f32
    %165 = vector.broadcast %cst_83 : f32 to vector<2x128xf32>
    %166 = arith.subf %165, %164 : vector<2x128xf32>
    %167 = math.exp %166 : vector<2x128xf32>
    %168 = math.log1p %167 : vector<2x128xf32>
    %169 = arith.addf %163, %168 : vector<2x128xf32>
    %cst_84 = arith.constant 0.000000e+00 : f32
    %170 = vector.broadcast %cst_84 : f32 to vector<2x128xf32>
    %171 = arith.subf %170, %169 : vector<2x128xf32>
    %172 = math.exp %171 : vector<2x128xf32>
    %cst_85 = arith.constant 1.000000e+00 : f32
    %173 = vector.broadcast %cst_85 : f32 to vector<2x128xf32>
    %174 = arith.subf %173, %172 : vector<2x128xf32>
    %175 = arith.mulf %174, %174 : vector<2x128xf32>
    %176 = arith.mulf %175, %169 : vector<2x128xf32>
    %177 = arith.addf %159, %176 : vector<2x128xf32>
    %c0_86 = arith.constant 0 : index
    %c0_87 = arith.constant 0 : index
    %178 = vector.load %arg5[%c0_86, %c0_87] : memref<2x128xf32, #tpu.memory_space<vmem>>, vector<2x128xf32>
    tpu.vector_store %arg5[%c0_86, %c0_87], %177 {strides = array<i32>} : memref<2x128xf32, #tpu.memory_space<vmem>>, vector<2x128xf32>,
    %c0_i32_88 = arith.constant 0 : i32
    %179 = arith.cmpi eq, %arg1, %c0_i32_88 : i32
    %180 = arith.extui %179 : i1 to i32
    %c0_i32_89 = arith.constant 0 : i32
    %181 = arith.cmpi ne, %180, %c0_i32_89 : i32
    scf.if %181 {
      %c0_90 = arith.constant 0 : index
      %c0_91 = arith.constant 0 : index
      %182 = vector.load %arg5[%c0_90, %c0_91] : memref<2x128xf32, #tpu.memory_space<vmem>>, vector<2x128xf32>
      %cst_92 = arith.constant dense<0.000000e+00> : vector<2xf32>
      %183 = vector.multi_reduction <add>, %182, %cst_92 [1] : vector<2x128xf32> to vector<2xf32>
      %184 = vector.shape_cast %183 : vector<2xf32> to vector<2x1xf32>
      %cst_93 = arith.constant 7.812500e-04 : f32
      %185 = vector.broadcast %cst_93 : f32 to vector<2x1xf32>
      %186 = arith.mulf %184, %185 : vector<2x1xf32>
      %c0_94 = arith.constant 0 : index
      %c0_95 = arith.constant 0 : index
      %187 = vector.load %arg4[%c0_94, %c0_95] : memref<2x1xf32, #tpu.memory_space<vmem>>, vector<2x1xf32>
      tpu.vector_store %arg4[%c0_94, %c0_95], %186 {strides = array<i32>} : memref<2x1xf32, #tpu.memory_space<vmem>>, vector<2x1xf32>,
    } else {
    }
    return
  }
  func.func @transform_0(%arg0: i32, %arg1: i32) -> (i32, i32) {
    %c0_i32 = arith.constant 0 : i32
    return %arg0, %arg1 : i32, i32
  }
  func.func @transform_1(%arg0: i32, %arg1: i32) -> (i32, i32) {
    %c0_i32 = arith.constant 0 : i32
    return %arg0, %arg1 : i32, i32
  }
  func.func @transform_2(%arg0: i32, %arg1: i32) -> (i32, i32) {
    %c0_i32 = arith.constant 0 : i32
    %c0_i32_0 = arith.constant 0 : i32
    return %arg0, %c0_i32 : i32, i32
  }
}

</mosaic_0001>

<bundles_post_ra>
// kernel: tpu_custom_call.1
= control target key start
LH: loop header
LB: loop body
LE: loop exit
PB: predicated region body
PF: predicated region fallthrough
CT: control target
= control target key end

     0   :  { %7 = vsyncpa [#allocation4], 0  ;;  %s507_s0 = inlined_call_operand.hbm [shape: f32[2,1024], index: 0, kind: input, shape index: {}]   ;;  %s508_s1 = inlined_call_operand.hbm [shape: f32[2,1024], index: 1, kind: input, shape index: {}]   ;;  %s509_s2 = inlined_call_operand.vmem [shape: f32[2,1], index: 2, kind: output, shape index: {}]  }
   0x1   :  { %8 = vsyncpa [#allocation6], 0  ;;  %s376_s9 = smov [#allocation3]   ;;  %s377_s11 = smov [#allocation5]  }
   0x2   :  { %s15_s10 = sshll.u32 %s376_s9, 4  ;;  %s25_s12 = sshll.u32 %s377_s11, 4  ;;  %s16_s10 = int_to_ptr.vmem [resolvable:$true] %s15_s10  ;;  %s26_s12 = int_to_ptr.vmem [resolvable:$true] %s25_s12 }
   0x3   :  { %s340_s13 = scalar_lea.vmem %s16_s10, 256  ;;  %p345_p1 = scmp.lt.s32.totalorder %s16_s10, %s16_s10 }
   0x4   :  { %p341_p0 = scmp.ne.s32.totalorder %s16_s10, %s340_s13  ;;  %p346_p2 = scmp.lt.s32.totalorder %s340_s13, %s340_s13 }
   0x6   :  { %p347_p3 = por %p346_p2, %p345_p1 }
   0x8   :  { %p348_p4 = pnand %p347_p3, %p341_p0 }
   0xa   :  { %351 = shalt.err (!%p348_p4)
}
   0xb   :  { %18 = dma.hbm_to_vmem [thread:$0]  %s507_s0, 256, %s16_s10, [#allocation4]  }
   0xc   :  { %s360_s16 = scalar_lea.vmem %s26_s12, 256  ;;  %p365_p6 = scmp.lt.s32.totalorder %s26_s12, %s26_s12 }
   0xd   :  { %p361_p5 = scmp.ne.s32.totalorder %s26_s12, %s360_s16  ;;  %p366_p7 = scmp.lt.s32.totalorder %s360_s16, %s360_s16 }
   0xf   :  { %p367_p8 = por %p366_p7, %p365_p6 }
  0x11   :  { %p368_p9 = pnand %p367_p8, %p361_p5 }
  0x13   :  { %371 = shalt.err (!%p368_p9)
}
  0x14   :  { %28 = dma.hbm_to_vmem [thread:$0]  %s508_s1, 256, %s26_s12, [#allocation6]  }
  0x15   :  { %372 = dma.done.wait [#allocation4], 256  }
  0x16   :  { %373 = vsyncadd [#allocation4], 4294967040 }
  0x17   :  { %374 = dma.done.wait [#allocation6], 256  }
  0x18   :  { %375 = vsyncadd [#allocation6], 4294967040  ;;  %v378_v0 = vmov 0.0   ;;  %v400_v1 = vld [vmem:[#allocation3] sm:$0x3]  ;;  %vm268_vm8 = vcmask 1041408  }
  0x19   :  { %39 = vst [vmem:[#allocation2] sm:$0x3] %v378_v0  ;;  %v402_v2 = vld [vmem:[#allocation3 + $0x2] sm:$0x3]  ;;  %v46_v3 = vand.u32 2147483647, %v400_v1 }
  0x1a   :  { %v74_v4 = vand.u32 2147483647, %v402_v2  ;;  %v406_v5 = vld [vmem:[#allocation3 + $0x4] sm:$0x3]  ;;  %v408_v7 = vld [vmem:[#allocation3 + $0x6] sm:$0x3] }
  0x1b   :  { %v47_v6 = vsub.f32 0.0, %v46_v3  ;;  %v102_v9 = vand.u32 2147483647, %v406_v5  ;;  %v130_v11 = vand.u32 2147483647, %v408_v7  ;;  %v43_v39 = vmax.f32 %v400_v1, 0.0 }
  0x1c   :  { %v75_v8 = vsub.f32 0.0, %v74_v4  ;;  %v412_v15 = vld [vmem:[#allocation3 + $0x8] sm:$0x3]  ;;  %v415_v20 = vld [vmem:[#allocation3 + $0xa] sm:$0x3]  ;;  %v71_v45 = vmax.f32 %v402_v2, 0.0 }
  0x1d   :  { %v48_v10 = vmul.f32 1.442695, %v47_v6  ;;  %v103_v13 = vsub.f32 0.0, %v102_v9  ;;  %v131_v14 = vsub.f32 0.0, %v130_v11  ;;  %v158_v18 = vand.u32 2147483647, %v412_v15 }
  0x1e   :  { %v76_v12 = vmul.f32 1.442695, %v75_v8  ;;  %v186_v23 = vand.u32 2147483647, %v415_v20  ;;  %v420_v32 = vld [vmem:[#allocation3 + $0xc] sm:$0x3] }
  0x1f   :  { %284 = vpow2.f32 %v48_v10  ;;  %v104_v16 = vmul.f32 1.442695, %v103_v13  ;;  %v132_v17 = vmul.f32 1.442695, %v131_v14  ;;  %v159_v19 = vsub.f32 0.0, %v158_v18 }
  0x20   :  { %286 = vpow2.f32 %v76_v12  ;;  %v187_v29 = vsub.f32 0.0, %v186_v23  ;;  %v41_v35 = vld [vmem:[#allocation5] sm:$0x3]  ;;  %v69_v37 = vld [vmem:[#allocation5 + $0x2] sm:$0x3]  ;;  %v99_v63 = vmax.f32 %v406_v5, 0.0 }
  0x21   :  { %288 = vpow2.f32 %v104_v16  ;;  %v160_v21 = vmul.f32 1.442695, %v159_v19  ;;  %v214_v38 = vand.u32 2147483647, %v420_v32  ;;  %v44_v42 = vmul.f32 %v41_v35, %v400_v1  ;;  %v97_v51 = vld [vmem:[#allocation5 + $0x4] sm:$0x3] }
  0x22   :  { %290 = vpow2.f32 %v132_v17  ;;  %v188_v34 = vmul.f32 1.442695, %v187_v29  ;;  %v72_v46 = vmul.f32 %v69_v37, %v402_v2  ;;  %v434_v58 = vld [vmem:[#allocation3 + $0xe] sm:$0x3]  ;;  %v100_v0 = vmul.f32 %v97_v51, %v406_v5 }
  0x23   :  { %292 = vpow2.f32 %v160_v21  ;;  %v215_v48 = vsub.f32 0.0, %v214_v38  ;;  %v45_v54 = vsub.f32 %v43_v39, %v44_v42  ;;  %v242_v8 = vand.u32 2147483647, %v434_v58 }
  0x24   :  { %v73_v61 = vsub.f32 %v71_v45, %v72_v46  ;;  %v101_v16 = vsub.f32 %v99_v63, %v100_v0  ;;  %v127_v29 = vmax.f32 %v408_v7, 0.0  ;;  %v155_v46 = vmax.f32 %v412_v15, 0.0 }
  0x25   :  { %v216_v1 = vmul.f32 1.442695, %v215_v48  ;;  %v243_v21 = vsub.f32 0.0, %v242_v8  ;;  %vm273_vm9 = vcmask 1024  }
  0x2c   :  { %v285_v22 = vpop.eup %284 }
  0x2d   :  { %v287_v24 = vpop.eup %286  ;;  %v50_v25 = vadd.f32 1.0, %v285_v22  ;;  %v53_v31 = vmul.f32 -0.5, %v285_v22  ;;  %v56_v43 = vand.u32 2147483647, %v285_v22 }
  0x2e   :  { %v78_v26 = vadd.f32 1.0, %v287_v24  ;;  %v289_v27 = vpop.eup %288  ;;  %v81_v33 = vmul.f32 -0.5, %v287_v24  ;;  %v84_v47 = vand.u32 2147483647, %v287_v24 }
  0x2f   :  { %294 = vlog2.f32 %v50_v25  ;;  %v106_v28 = vadd.f32 1.0, %v289_v27  ;;  %v418_v30 = vpop.eup %290  ;;  %v54_v40 = vadd.f32 1.0, %v53_v31  ;;  %v109_v41 = vmul.f32 -0.5, %v289_v27 }
  0x30   :  { %296 = vlog2.f32 %v78_v26  ;;  %v134_v36 = vadd.f32 1.0, %v418_v30  ;;  %v82_v44 = vadd.f32 1.0, %v81_v33  ;;  %v428_v49 = vpop.eup %292  ;;  %vm430_vm0 = vcmp.lt.f32.partialorder %v56_v43, 0.0004427343  ;;  %v153_v43 = vld [vmem:[#allocation5 + $0x8] sm:$0x3] }
  0x31   :  { %298 = vlog2.f32 %v106_v28  ;;  %v55_v50 = vmul.f32 %v285_v22, %v54_v40  ;;  %v110_v52 = vadd.f32 1.0, %v109_v41  ;;  %v112_v57 = vand.u32 2147483647, %v289_v27 }
  0x32   :  { %300 = vpow2.f32 %v188_v34  ;;  %v83_v56 = vmul.f32 %v287_v24, %v82_v44  ;;  %vm85_vm1 = vcmp.lt.f32.partialorder %v84_v47, 0.0004427343  ;;  %v162_v6 = vadd.f32 1.0, %v428_v49  ;;  %v125_v24 = vld [vmem:[#allocation5 + $0x6] sm:$0x3] }
  0x33   :  { %302 = vlog2.f32 %v134_v36  ;;  %v111_v4 = vmul.f32 %v289_v27, %v110_v52  ;;  %vm442_vm2 = vcmp.lt.f32.partialorder %v112_v57, 0.0004427343  ;;  %v137_v5 = vmul.f32 -0.5, %v418_v30 }
  0x34   :  { %304 = vpow2.f32 %v216_v1  ;;  %v140_v28 = vand.u32 2147483647, %v418_v30  ;;  %v128_v31 = vmul.f32 %v125_v24, %v408_v7  ;;  %v244_v33 = vmul.f32 1.442695, %v243_v21  ;;  %v181_v1 = vld [vmem:[#allocation5 + $0xa] sm:$0x3] }
  0x35   :  { %306 = vlog2.f32 %v162_v6  ;;  %v138_v25 = vadd.f32 1.0, %v137_v5  ;;  %v165_v38 = vmul.f32 -0.5, %v428_v49  ;;  %v156_v47 = vmul.f32 %v153_v43, %v412_v15 }
  0x36   :  { %vm141_vm3 = vcmp.lt.f32.partialorder %v140_v28, 0.0004427343  ;;  %v129_v39 = vsub.f32 %v127_v29, %v128_v31  ;;  %v184_v12 = vmul.f32 %v181_v1, %v415_v20 }
  0x37   :  { %v139_v35 = vmul.f32 %v418_v30, %v138_v25  ;;  %v166_v7 = vadd.f32 1.0, %v165_v38  ;;  %v168_v30 = vand.u32 2147483647, %v428_v49 }
  0x39   :  { %v167_v51 = vmul.f32 %v428_v49, %v166_v7  ;;  %vm473_vm4 = vcmp.lt.f32.partialorder %v168_v30, 0.0004427343 }
  0x3c   :  { %v295_v53 = vpop.eup %294 }
  0x3d   :  { %v297_v59 = vpop.eup %296  ;;  %v52_v60 = vmul.f32 0.6931472, %v295_v53 }
  0x3e   :  { %v80_v62 = vmul.f32 0.6931472, %v297_v59  ;;  %v299_v2 = vpop.eup %298 }
  0x3f   :  { %v58_v3 = vsel %vm430_vm0, %v55_v50, %v52_v60  ;;  %v108_v11 = vmul.f32 0.6931472, %v299_v2  ;;  %v452_v22 = vpop.eup %300  ;;  %v157_v60 = vsub.f32 %v155_v46, %v156_v47  ;;  %v237_v47 = vld [vmem:[#allocation5 + $0xe] sm:$0x3] }
  0x40   :  { %v59_v9 = vadd.f32 %v58_v3, %v45_v54  ;;  %v86_v10 = vsel %vm85_vm1, %v83_v56, %v80_v62  ;;  %v303_v26 = vpop.eup %302  ;;  %v190_v36 = vadd.f32 1.0, %v452_v22  ;;  %v193_v57 = vmul.f32 -0.5, %v452_v22 }
  0x41   :  { %v446_v13 = vadd.f32 %v86_v10, %v73_v61  ;;  %v114_v18 = vsel %vm442_vm2, %v111_v4, %v108_v11  ;;  %v136_v34 = vmul.f32 0.6931472, %v303_v26  ;;  %v463_v42 = vpop.eup %304  ;;  %v42_v61 = vld [vmem:[#allocation2] sm:$0x3]  ;;  %v196_v8 = vand.u32 2147483647, %v452_v22 }
  0x42   :  { %v60_v14 = vsub.f32 0.0, %v59_v9  ;;  %v454_v27 = vadd.f32 %v114_v18, %v101_v16  ;;  %v307_v44 = vpop.eup %306  ;;  %v218_v52 = vadd.f32 1.0, %v463_v42  ;;  %v194_v2 = vadd.f32 1.0, %v193_v57 }
  0x43   :  { %v88_v17 = vsub.f32 0.0, %v446_v13  ;;  %v142_v40 = vsel %vm141_vm3, %v139_v35, %v136_v34  ;;  %v164_v50 = vmul.f32 0.6931472, %v307_v44  ;;  %v183_v11 = vmax.f32 %v415_v20, 0.0  ;;  %v209_v20 = vld [vmem:[#allocation5 + $0xc] sm:$0x3] }
  0x44   :  { %v61_v19 = vmul.f32 1.442695, %v60_v14  ;;  %v116_v37 = vsub.f32 0.0, %v454_v27  ;;  %v465_v45 = vadd.f32 %v142_v40, %v129_v39  ;;  %v195_v5 = vmul.f32 %v452_v22, %v194_v2 }
  0x45   :  { %v89_v23 = vmul.f32 1.442695, %v88_v17  ;;  %v170_v15 = vsel %vm473_vm4, %v167_v51, %v164_v50  ;;  %vm197_vm5 = vcmp.lt.f32.partialorder %v196_v8, 0.0004427343  ;;  %v221_v18 = vmul.f32 -0.5, %v463_v42 }
  0x46   :  { %308 = vpow2.f32 %v61_v19  ;;  %v117_v41 = vmul.f32 1.442695, %v116_v37  ;;  %v144_v54 = vsub.f32 0.0, %v465_v45  ;;  %v482_v6 = vadd.f32 %v170_v15, %v157_v60 }
  0x47   :  { %310 = vpow2.f32 %v89_v23  ;;  %v185_v21 = vsub.f32 %v183_v11, %v184_v12  ;;  %v222_v28 = vadd.f32 1.0, %v221_v18  ;;  %v211_v35 = vmax.f32 %v420_v32, 0.0 }
  0x48   :  { %312 = vpow2.f32 %v244_v33  ;;  %v145_v63 = vmul.f32 1.442695, %v144_v54  ;;  %v172_v16 = vsub.f32 0.0, %v482_v6  ;;  %v224_v33 = vand.u32 2147483647, %v463_v42 }
  0x49   :  { %314 = vlog2.f32 %v190_v36  ;;  %v223_v37 = vmul.f32 %v463_v42, %v222_v28  ;;  %v240_v54 = vmul.f32 %v237_v47, %v434_v58 }
  0x4a   :  { %316 = vpow2.f32 %v117_v41  ;;  %v173_v25 = vmul.f32 1.442695, %v172_v16  ;;  %vm225_vm6 = vcmp.lt.f32.partialorder %v224_v33, 0.0004427343 }
  0x4b   :  { %318 = vlog2.f32 %v218_v52 }
  0x4c   :  { %320 = vpow2.f32 %v145_v63 }
  0x53   :  { %v309_v48 = vpop.eup %308 }
  0x54   :  { %v63_v53 = vsub.f32 1.0, %v309_v48  ;;  %v311_v56 = vpop.eup %310 }
  0x55   :  { %v91_v62 = vsub.f32 1.0, %v311_v56  ;;  %v480_v0 = vpop.eup %312 }
  0x56   :  { %v64_v59 = vmul.f32 %v63_v53, %v63_v53  ;;  %v315_v3 = vpop.eup %314  ;;  %v246_v14 = vadd.f32 1.0, %v480_v0  ;;  %v249_v40 = vmul.f32 -0.5, %v480_v0  ;;  %v252_v52 = vand.u32 2147483647, %v480_v0 }
  0x57   :  { %v92_v10 = vmul.f32 %v91_v62, %v91_v62  ;;  %v317_v17 = vpop.eup %316  ;;  %v239_v53 = vmax.f32 %v434_v58, 0.0 }
  0x58   :  { %v65_v49 = vmul.f32 %v64_v59, %v59_v9  ;;  %v192_v9 = vmul.f32 0.6931472, %v315_v3  ;;  %322 = vlog2.f32 %v246_v14  ;;  %v119_v24 = vsub.f32 1.0, %v317_v17  ;;  %v319_v29 = vpop.eup %318 }
  0x59   :  { %v93_v19 = vmul.f32 %v92_v10, %v446_v13  ;;  %324 = vpow2.f32 %v173_v25  ;;  %v212_v13 = vmul.f32 %v209_v20, %v420_v32  ;;  %v220_v36 = vmul.f32 0.6931472, %v319_v29  ;;  %v321_v39 = vpop.eup %320 }
  0x5a   :  { %v66_v4 = vadd.f32 %v65_v49, %v42_v61  ;;  %v198_v23 = vsel %vm197_vm5, %v195_v5, %v192_v9  ;;  %v120_v34 = vmul.f32 %v119_v24, %v119_v24  ;;  %v147_v44 = vsub.f32 1.0, %v321_v39 }
  0x5b   :  { %v199_v31 = vadd.f32 %v198_v23, %v185_v21  ;;  %v213_v43 = vsub.f32 %v211_v35, %v212_v13  ;;  %v226_v7 = vsel %vm225_vm6, %v223_v37, %v220_v36  ;;  %v250_v48 = vadd.f32 1.0, %v249_v40 }
  0x5c   :  { %67 = vst [vmem:[#allocation2] sm:$0x3] %v66_v4  ;;  %v121_v41 = vmul.f32 %v120_v34, %v454_v27  ;;  %v148_v42 = vmul.f32 %v147_v44, %v147_v44  ;;  %vm253_vm7 = vcmp.lt.f32.partialorder %v252_v52, 0.0004427343  ;;  %v241_v60 = vsub.f32 %v239_v53, %v240_v54 }
  0x5d   :  { %v200_v38 = vsub.f32 0.0, %v199_v31  ;;  %v227_v32 = vadd.f32 %v226_v7, %v213_v43  ;;  %v251_v55 = vmul.f32 %v480_v0, %v250_v48 }
  0x5e   :  { %v149_v59 = vmul.f32 %v148_v42, %v465_v45 }
  0x5f   :  { %v201_v30 = vmul.f32 1.442695, %v200_v38  ;;  %v228_v56 = vsub.f32 0.0, %v227_v32 }
  0x61   :  { %326 = vpow2.f32 %v201_v30  ;;  %v229_v49 = vmul.f32 1.442695, %v228_v56 }
  0x63   :  { %v70_v26 = vld [vmem:[#allocation2] sm:$0x3]  ;;  %328 = vpow2.f32 %v229_v49 }
  0x64   :  { %v94_v22 = vadd.f32 %v93_v19, %v70_v26 }
  0x65   :  { %v323_v50 = vpop.eup %322 }
  0x66   :  { %95 = vst [vmem:[#allocation2] sm:$0x3] %v94_v22  ;;  %v248_v27 = vmul.f32 0.6931472, %v323_v50  ;;  %v325_v57 = vpop.eup %324 }
  0x67   :  { %v175_v15 = vsub.f32 1.0, %v325_v57 }
  0x68   :  { %v254_v61 = vsel %vm253_vm7, %v251_v55, %v248_v27 }
  0x69   :  { %v255_v1 = vadd.f32 %v254_v61, %v241_v60  ;;  %v176_v2 = vmul.f32 %v175_v15, %v175_v15 }
  0x6b   :  { %v256_v3 = vsub.f32 0.0, %v255_v1  ;;  %v177_v4 = vmul.f32 %v176_v2, %v482_v6 }
  0x6d   :  { %v98_v46 = vld [vmem:[#allocation2] sm:$0x3]  ;;  %v257_v8 = vmul.f32 1.442695, %v256_v3 }
  0x6e   :  { %v122_v51 = vadd.f32 %v121_v41, %v98_v46  ;;  %v327_v58 = vpop.eup %326 }
  0x6f   :  { %v203_v0 = vsub.f32 1.0, %v327_v58  ;;  %330 = vpow2.f32 %v257_v8 }
  0x70   :  { %123 = vst [vmem:[#allocation2] sm:$0x3] %v122_v51  ;;  %v329_v12 = vpop.eup %328 }
  0x71   :  { %v204_v45 = vmul.f32 %v203_v0, %v203_v0  ;;  %v231_v5 = vsub.f32 1.0, %v329_v12 }
  0x73   :  { %v205_v9 = vmul.f32 %v204_v45, %v199_v31  ;;  %v232_v17 = vmul.f32 %v231_v5, %v231_v5 }
  0x75   :  { %v233_v19 = vmul.f32 %v232_v17, %v227_v32 }
  0x77   :  { %v126_v62 = vld [vmem:[#allocation2] sm:$0x3] }
  0x78   :  { %v150_v63 = vadd.f32 %v149_v59, %v126_v62 }
  0x7a   :  { %151 = vst [vmem:[#allocation2] sm:$0x3] %v150_v63 }
  0x7c   :  { %v331_v18 = vpop.eup %330 }
  0x7d   :  { %v259_v21 = vsub.f32 1.0, %v331_v18 }
  0x7f   :  { %v260_v6 = vmul.f32 %v259_v21, %v259_v21 }
  0x81   :  { %v154_v10 = vld [vmem:[#allocation2] sm:$0x3]  ;;  %v261_v25 = vmul.f32 %v260_v6, %v255_v1 }
  0x82   :  { %v178_v11 = vadd.f32 %v177_v4, %v154_v10 }
  0x84   :  { %179 = vst [vmem:[#allocation2] sm:$0x3] %v178_v11 }
  0x8b   :  { %v182_v14 = vld [vmem:[#allocation2] sm:$0x3] }
  0x8c   :  { %v206_v16 = vadd.f32 %v205_v9, %v182_v14 }
  0x8e   :  { %207 = vst [vmem:[#allocation2] sm:$0x3] %v206_v16 }
  0x95   :  { %v210_v23 = vld [vmem:[#allocation2] sm:$0x3] }
  0x96   :  { %v234_v24 = vadd.f32 %v233_v19, %v210_v23 }
  0x98   :  { %235 = vst [vmem:[#allocation2] sm:$0x3] %v234_v24 }
  0x9f   :  { %v238_v26 = vld [vmem:[#allocation2] sm:$0x3] }
  0xa0   :  { %v262_v20 = vadd.f32 %v261_v25, %v238_v26 }
  0xa2   :  { %263 = vst [vmem:[#allocation2] sm:$0x3] %v262_v20 }
  0xa9   :  { %v267_v28 = vld [vmem:[#allocation2] sm:$0x3] }
  0xaa   :  { %v269_v29 = vsel %vm268_vm8, %v267_v28, 0.0 }
  0xab   :  { %270 = vadd.xlane.f32.xlu0 %v269_v29 }
 0x134   :  { %v271_v22 = vpop.xlane.xlu0 %270 }
 0x135   :  { %v272_v31 = vmul.f32 0.00078125, %v271_v22 }
 0x137   :  { %274 = vst.msk [vmem:[%s509_s2] sm:$0x3] %vm273_vm9, %v272_v31 }
 0x138   :  { %279 = vsyncpa [#allocation4], 1 }
 0x139   :  { %280 = vsyncpa [#allocation6], 1 }

</bundles_post_ra>
